<compile_context>
chip_gen: v5e
topology: v5e:2x2
jax: 0.10.0
libtpu: 0.0.40
codegen_flags: <defaults>
</compile_context>

<pallas_src>
import jax
import jax.numpy as jnp
from jax.experimental import pallas as pl
from jax.experimental.pallas import tpu as pltpu


def _mlp_kernel(xt_ref, w1t_ref, b1_ref, w2_ref, b2_ref, out_ref):
    # xt_ref : (F, TILE_B)  batch on lanes     w1t_ref: (H, F)
    # b1_ref : (H, 1)       w2_ref : (H, 1)    b2_ref : (1,) in SMEM
    # out_ref: (1, TILE_B)  lane-dense output block
    # Layer 1 on the MXU: (H, F) @ (F, TILE_B) -> (H, TILE_B), f32 accumulate.
    h = jnp.dot(w1t_ref[...], xt_ref[...], preferred_element_type=jnp.float32)
    h = jnp.tanh(h + b1_ref[...])                       # bias broadcast over lanes
    # Layer 2 (output width 1): VPU multiply + sublane reduce, MXU stays off this path.
    z = jnp.sum(h * w2_ref[...], axis=0, keepdims=True) + b2_ref[0]
    out_ref[...] = jax.nn.sigmoid(z).astype(out_ref.dtype)


def _round_up(n: int, m: int) -> int:
    return ((n + m - 1) // m) * m


def distributed_net_l_forward(x, w1, b1, w2, b2, *, max_tile_b=1024):
    """Forward pass of DistributedNetL.

    x : (B, input_size) float32
    w1: (input_size, 10) float32   b1: (10,) float32
    w2: (10, 1) float32            b2: (1,) float32
    returns (B, 1) float32
    """
    B, F = x.shape
    H = w1.shape[1]

    # Pick a lane-aligned batch tile; cap it so 2x double-buffered tiles stay tiny
    # in VMEM on every generation (v5e/v6e/v7x).
    tile_b = min(max_tile_b, _round_up(max(B, 1), 128))
    b_pad = _round_up(B, tile_b)
    num_tiles = b_pad // tile_b

    # Layout plumbing outside the kernel: pad batch and put it on the lane dim.
    x_pad = jnp.pad(x, ((0, b_pad - B), (0, 0)))
    xt = x_pad.T                      # (F, b_pad), lane-dense in batch
    w1t = w1.T                        # (H, F)
    b1_col = b1.reshape(H, 1)
    w2_col = w2.reshape(H, 1)
    b2_s = b2.reshape(1,)

    out = pl.pallas_call(
        _mlp_kernel,
        out_shape=jax.ShapeDtypeStruct((1, b_pad), jnp.float32),
        grid_spec=pltpu.PrefetchScalarGridSpec(
            num_scalar_prefetch=0,
            grid=(num_tiles,),
            in_specs=[
                pl.BlockSpec((F, tile_b), lambda i: (0, i)),        # x^T tile
                pl.BlockSpec((H, F), lambda i: (0, 0)),             # W1^T (pinned)
                pl.BlockSpec((H, 1), lambda i: (0, 0)),             # b1    (pinned)
                pl.BlockSpec((H, 1), lambda i: (0, 0)),             # w2    (pinned)
                pl.BlockSpec(memory_space=pltpu.MemorySpace.SMEM),  # b2 scalar
            ],
            out_specs=pl.BlockSpec((1, tile_b), lambda i: (0, i)),  # lane-dense out
        ),
        compiler_params=pltpu.CompilerParams(
            dimension_semantics=("parallel",),
        ),
    )(xt, w1t, b1_col, w2_col, b2_s)

    # (1, b_pad) -> drop padding -> (B, 1)
    return out[0, :B].reshape(B, 1)


def _init_params(key, input_size, hidden=10, out=1):
    """Deterministic init mirroring torch.nn.Linear default: U(-1/sqrt(fan_in), 1/sqrt(fan_in))."""
    k1, k2, k3, k4 = jax.random.split(key, 4)
    bound1 = 1.0 / jnp.sqrt(jnp.float32(input_size))
    bound2 = 1.0 / jnp.sqrt(jnp.float32(hidden))
    w1 = jax.random.uniform(k1, (input_size, hidden), jnp.float32, -bound1, bound1)
    b1 = jax.random.uniform(k2, (hidden,), jnp.float32, -bound1, bound1)
    w2 = jax.random.uniform(k3, (hidden, out), jnp.float32, -bound2, bound2)
    b2 = jax.random.uniform(k4, (out,), jnp.float32, -bound2, bound2)
    return w1, b1, w2, b2


def _reference(x, w1, b1, w2, b2):
    h = jnp.tanh(x @ w1 + b1)
    return jax.nn.sigmoid(h @ w2 + b2)


if __name__ == "__main__":
    key = jax.random.PRNGKey(0)
    k_x, k_x2, k_p = jax.random.split(key, 3)

    input_size = 7  # Thymio proximity-sensor count (sensing vector length)
    w1, b1, w2, b2 = _init_params(k_p, input_size)

    # Case 1: spec-sized tiny batch (single grid step, padded to one 128-lane tile).
    x_small = jax.random.normal(k_x, (8, input_size), dtype=jnp.float32)
    y_small = jax.block_until_ready(distributed_net_l_forward(x_small, w1, b1, w2, b2))
    y_small_ref = _reference(x_small, w1, b1, w2, b2)
    assert y_small.shape == (8, 1)
    assert jnp.allclose(y_small, y_small_ref, atol=2e-5, rtol=1e-4), "small-batch mismatch"

    # Case 2: ragged batch exercising the multi-tile grid + padding path.
    x_big = jax.random.normal(k_x2, (300, input_size), dtype=jnp.float32)
    y_big = jax.block_until_ready(
        distributed_net_l_forward(x_big, w1, b1, w2, b2, max_tile_b=128)
    )
    y_big_ref = _reference(x_big, w1, b1, w2, b2)
    assert y_big.shape == (300, 1)
    assert jnp.allclose(y_big, y_big_ref, atol=2e-5, rtol=1e-4), "gridded-batch mismatch"

    print("KERNEL_OK")
</pallas_src>

<mosaic_0001>
module attributes {stable_mosaic.version = 11 : i64} {
  func.func @_mlp_kernel(%arg0: i32, %arg1: memref<7x128xf32, #tpu.memory_space<vmem>>, %arg2: memref<10x7xf32, #tpu.memory_space<vmem>>, %arg3: memref<10x1xf32, #tpu.memory_space<vmem>>, %arg4: memref<10x1xf32, #tpu.memory_space<vmem>>, %arg5: memref<1xf32, #tpu.memory_space<smem>>, %arg6: memref<1x128xf32, #tpu.memory_space<vmem>>) attributes {dimension_semantics = [#tpu.dimension_semantics<parallel>], iteration_bounds = array<i64: 1>, scalar_prefetch = 0 : i64, scratch_operands = 0 : i64, tpu.core_type = #tpu.core_type<tc>, window_params = [{transform_indices = @transform_0, window_bounds = array<i64: 7, 128>}, {pipeline_mode = #tpu.pipeline_mode<synchronous>, transform_indices = @transform_1, window_bounds = array<i64: 10, 7>}, {pipeline_mode = #tpu.pipeline_mode<synchronous>, transform_indices = @transform_2, window_bounds = array<i64: 10, 1>}, {pipeline_mode = #tpu.pipeline_mode<synchronous>, transform_indices = @transform_3, window_bounds = array<i64: 10, 1>}, {transform_indices = @transform_4, window_bounds = array<i64: 1>}, {transform_indices = @transform_5, window_bounds = array<i64: 1, 128>}]} {
    %c0 = arith.constant 0 : index
    %c0_0 = arith.constant 0 : index
    %0 = vector.load %arg2[%c0, %c0_0] : memref<10x7xf32, #tpu.memory_space<vmem>>, vector<10x7xf32>
    %c0_1 = arith.constant 0 : index
    %c0_2 = arith.constant 0 : index
    %1 = vector.load %arg1[%c0_1, %c0_2] : memref<7x128xf32, #tpu.memory_space<vmem>>, vector<7x128xf32>
    %cst = arith.constant dense<0.000000e+00> : vector<10x128xf32>
    %2 = tpu.matmul %0, %1, %cst {dimension_numbers = #tpu.dot_dimension_numbers<[1], [0], [0], [1], [0, 0, 1, 1], [], []>} : vector<10x7xf32>, vector<7x128xf32>, vector<10x128xf32> -> vector<10x128xf32>
    %c0_3 = arith.constant 0 : index
    %c0_4 = arith.constant 0 : index
    %3 = vector.load %arg3[%c0_3, %c0_4] : memref<10x1xf32, #tpu.memory_space<vmem>>, vector<10x1xf32>
    %4 = vector.broadcast %3 : vector<10x1xf32> to vector<10x128xf32>
    %5 = arith.addf %2, %4 : vector<10x128xf32>
    %6 = math.tanh %5 : vector<10x128xf32>
    %c0_5 = arith.constant 0 : index
    %c0_6 = arith.constant 0 : index
    %7 = vector.load %arg4[%c0_5, %c0_6] : memref<10x1xf32, #tpu.memory_space<vmem>>, vector<10x1xf32>
    %8 = vector.broadcast %7 : vector<10x1xf32> to vector<10x128xf32>
    %9 = arith.mulf %6, %8 : vector<10x128xf32>
    %cst_7 = arith.constant dense<0.000000e+00> : vector<128xf32>
    %10 = vector.multi_reduction <add>, %9, %cst_7 [0] : vector<10x128xf32> to vector<128xf32>
    %11 = vector.shape_cast %10 : vector<128xf32> to vector<1x128xf32>
    %c0_8 = arith.constant 0 : index
    %12 = memref.load %arg5[%c0_8] : memref<1xf32, #tpu.memory_space<smem>>
    %13 = vector.broadcast %12 : f32 to vector<1x128xf32>
    %14 = arith.addf %11, %13 : vector<1x128xf32>
    %15 = arith.negf %14 : vector<1x128xf32>
    %16 = math.exp %15 : vector<1x128xf32>
    %cst_9 = arith.constant 1.000000e+00 : f32
    %17 = vector.broadcast %cst_9 : f32 to vector<1x128xf32>
    %18 = arith.addf %17, %16 : vector<1x128xf32>
    %19 = arith.divf %17, %18 : vector<1x128xf32>
    %c0_10 = arith.constant 0 : index
    %c0_11 = arith.constant 0 : index
    %20 = vector.load %arg6[%c0_10, %c0_11] : memref<1x128xf32, #tpu.memory_space<vmem>>, vector<1x128xf32>
    tpu.vector_store %arg6[%c0_10, %c0_11], %19 {strides = array<i32>} : memref<1x128xf32, #tpu.memory_space<vmem>>, vector<1x128xf32>,
    return
  }
  func.func @transform_0(%arg0: i32) -> (i32, i32) {
    %c0_i32 = arith.constant 0 : i32
    %c0_i32_0 = arith.constant 0 : i32
    return %c0_i32, %arg0 : i32, i32
  }
  func.func @transform_1(%arg0: i32) -> (i32, i32) {
    %c0_i32 = arith.constant 0 : i32
    %c0_i32_0 = arith.constant 0 : i32
    %c0_i32_1 = arith.constant 0 : i32
    return %c0_i32, %c0_i32_0 : i32, i32
  }
  func.func @transform_2(%arg0: i32) -> (i32, i32) {
    %c0_i32 = arith.constant 0 : i32
    %c0_i32_0 = arith.constant 0 : i32
    %c0_i32_1 = arith.constant 0 : i32
    return %c0_i32, %c0_i32_0 : i32, i32
  }
  func.func @transform_3(%arg0: i32) -> (i32, i32) {
    %c0_i32 = arith.constant 0 : i32
    %c0_i32_0 = arith.constant 0 : i32
    %c0_i32_1 = arith.constant 0 : i32
    return %c0_i32, %c0_i32_0 : i32, i32
  }
  func.func @transform_4(%arg0: i32) -> i32 {
    %c0_i32 = arith.constant 0 : i32
    %c0_i32_0 = arith.constant 0 : i32
    return %c0_i32 : i32
  }
  func.func @transform_5(%arg0: i32) -> (i32, i32) {
    %c0_i32 = arith.constant 0 : i32
    %c0_i32_0 = arith.constant 0 : i32
    return %c0_i32, %arg0 : i32, i32
  }
}

</mosaic_0001>

<bundles_post_ra>
// kernel: tpu_custom_call.1
= control target key start
LH: loop header
LB: loop body
LE: loop exit
PB: predicated region body
PF: predicated region fallthrough
CT: control target
= control target key end

     0   :  { %vm44_vm0 = vcmask 1046528   ;;  %v178_v2 = vmov 0   ;;  %vm37_vm1 = vcmask 56320   ;;  %s237_s0 = inlined_call_operand.vmem [shape: f32[7,128], index: 0, kind: input, shape index: {}]   ;;  %s238_s1 = inlined_call_operand.vmem [shape: f32[10,7], index: 1, kind: input, shape index: {}]   ;;  %s239_s2 = inlined_call_operand.vmem [shape: f32[10,1], index: 2, kind: input, shape index: {}]   ;;  %s240_s3 = inlined_call_operand.vmem [shape: f32[10,1], index: 3, kind: input, shape index: {}]   ;;  %s241_s4 = inlined_call_operand.<no memory space> [shape: f32[1], index: 4, kind: input, shape index: {}]   ;;  %s242_s5 = inlined_call_operand.hbm [shape: f32[1,128], index: 5, kind: output, shape index: {}]  }
   0x1   :  { %v24_v0 = vld [vmem:[%s237_s0] sm:$0x7f]  ;;  %v26_v1 = vld [vmem:[%s239_s2 + $0x8] sm:$0x3]  ;;  %142 = vset.pattern.permute.xlu0 %v178_v2 }
   0x2   :  { %135 = vmatpush.msk.msra.mxu0 %vm44_vm0, %v24_v0  ;;  %v22_v3 = vld [vmem:[%s238_s1] sm:$0xff]  ;;  %v23_v4 = vld [vmem:[%s238_s1 + $0x8] sm:$0x3]  ;;  %139 = vmatpush.msk.msra.mxu1 %vm44_vm0, %v24_v0 }
   0x3   :  { %34 = vperm.xlu0 %142, %v26_v1   ;;  %v74_v5 = vld [vmem:[%s240_s3 + $0x8] sm:$0x3] }
   0x4   :  { %11 = vsyncpa [#allocation4], 0  ;;  %136 = vmatmul.msk.f32.vlgmr.msra.gmra.mxu0 %vm37_vm1, %v22_v3  ;;  %137 = vmatmul.msk.f32.vlgmr.msra.gmra.mxu1 %vm37_vm1, %v23_v4  ;;  %v25_v6 = vld [vmem:[%s239_s2] sm:$0xff]  ;;  %vm87_vm2 = vcmask 1041408   ;;  %v97_v27 = vstv %s241_s4  ;;  %s126_s4 = sshll.u32 %s242_s5, 4  ;;  %s127_s4 = int_to_ptr.hbm [resolvable:$true] %s126_s4 }
   0x5   :  { %143 = vset.pattern.permute.xlu1 %v178_v2  ;;  %v73_v7 = vld [vmem:[%s240_s3] sm:$0xff]  ;;  %s179_s3 = smov [#allocation3]  }
   0x6   :  { %82 = vperm.xlu1 %143, %v74_v5   ;;  %s124_s6 = sshll.u32 %s179_s3, 4  ;;  %s125_s6 = int_to_ptr.vmem [resolvable:$true] %s124_s6 }
   0xb   :  { %29 = vperm.xlu0 %142, %v25_v6  }
   0xe   :  { %77 = vperm.xlu1 %143, %v73_v7  }
  0x75   :  { %v35_v8 = vpop.permute.xlu0 %34 }
  0x78   :  { %v83_v9 = vpop.permute.xlu1 %82 }
  0x7d   :  { %v30_v10 = vpop.permute.xlu0 %29 }
  0x80   :  { %v78_v16 = vpop.permute.xlu1 %77 }
  0x81   :  { %v65_v11 = vpop.f32.mrf.mxu0  ;;  %v68_v12 = vpop.f32.mrf.mxu1 }
  0x82   :  { %v66_v13 = vadd.f32 %v65_v11, %v30_v10  ;;  %v69_v14 = vadd.f32 %v68_v12, %v35_v8 }
  0x84   :  { %144 = vtanh.f32 %v66_v13 }
  0x85   :  { %146 = vtanh.f32 %v69_v14 }
  0x8a   :  { %v145_v15 = vpop.eup %144 }
  0x8b   :  { %v147_v17 = vpop.eup %146  ;;  %v85_v18 = vmul.f32 %v145_v15, %v78_v16 }
  0x8c   :  { %v86_v19 = vmul.f32 %v147_v17, %v83_v9 }
  0x8e   :  { %v88_v20 = vsel %vm87_vm2, %v86_v19, 0.0 }
  0x8f   :  { %v89_v21 = vadd.f32 %v88_v20, %v85_v18 }
  0x91   :  { %v90_v22 = vrot.slane %v89_v21, 4 }
  0x93   :  { %v91_v23 = vadd.f32 %v90_v22, %v89_v21 }
  0x95   :  { %v92_v24 = vrot.slane %v91_v23, 2 }
  0x97   :  { %v93_v25 = vadd.f32 %v92_v24, %v91_v23 }
  0x99   :  { %v94_v26 = vrot.slane %v93_v25, 1 }
  0x9b   :  { %v95_v28 = vadd.f32 %v94_v26, %v93_v25 }
  0x9d   :  { %v98_v29 = vadd.f32 %v97_v27, %v95_v28 }
  0x9f   :  { %v138_v30 = vmul.f32 -1.442695, %v98_v29 }
  0xa1   :  { %148 = vpow2.f32 %v138_v30 }
  0xa7   :  { %v149_v31 = vpop.eup %148 }
  0xa8   :  { %v102_v32 = vadd.f32 1.0, %v149_v31 }
  0xaa   :  { %150 = vrcp.f32 %v102_v32  ;;  %v114_v36 = vand.u32 2147483648, %v102_v32  ;;  %v112_v38 = vand.u32 2147483647, %v102_v32  ;;  %vm108_vm4 = vweird.f32 %v102_v32 }
  0xac   :  { %v115_v40 = vor.u32 1.1754944e-38, %v114_v36  ;;  %vm113_vm6 = vcmp.eq.f32.partialorder %v112_v38, 8.507059e+37 }
  0xb0   :  { %v151_v33 = vpop.eup %150 }
  0xb1   :  { %v104_v34 = vmul.f32 %v151_v33, %v102_v32  ;;  %vm109_vm3 = vweird.f32 %v151_v33 }
  0xb2   :  { %vm110_vm5 = vmor %vm108_vm4, %vm109_vm3 }
  0xb3   :  { %v105_v35 = vsub.f32 1.0, %v104_v34 }
  0xb5   :  { %v106_v37 = vmul.f32 %v151_v33, %v105_v35 }
  0xb7   :  { %v107_v39 = vadd.f32 %v151_v33, %v106_v37 }
  0xb9   :  { %v111_v41 = vsel %vm110_vm5, %v151_v33, %v107_v39 }
  0xba   :  { %v116_v42 = vsel %vm113_vm6, %v115_v40, %v111_v41 }
  0xbb   :  { %118 = vst [vmem:[#allocation3] sm:$0x1] %v116_v42 }
  0xbc   :  { %129 = dma.vmem_to_hbm [thread:$0]  %s125_s6, 16, %s127_s4, [#allocation4]  }
  0xbd   :  { %176 = dma.done.wait [#allocation4], 16  }
  0xbe   :  { %177 = vsyncadd [#allocation4], 4294967280 }
  0xbf   :  { %134 = vsyncpa [#allocation4], 1 }

</bundles_post_ra>
